<compile_context>
chip_gen: v7x
topology: tpu7x:2x2x1
jax: 0.10.0
libtpu: 0.0.40
codegen_flags: <defaults>
</compile_context>

<pallas_src>
import numpy as np
import jax
import jax.numpy as jnp
from jax.experimental import pallas as pl
from jax.experimental.pallas import tpu as pltpu


_TB_CAP = 512  # hard cap on rows per grid step (multiple of 8)


def _make_lat_weights():
    # Exactly the module's __init__ (length 1040).
    lat = np.arange(0, 65, 0.0625)
    w = np.cos(lat * np.pi / 180.0)
    w = 1040.0 * w / np.sum(w)
    # TODO(synk): PyTorch keeps these weights (and the promoted loss) in
    # float64; TPU compute here is float32.
    return jnp.asarray(w, dtype=jnp.float32)


def _accum_chunk(x_ref, y_ref, out_ref, start, valid_rows):
    """Accumulate |x - y| for one 8-row chunk of the current block."""
    xr = x_ref[pl.ds(start, 8), :].astype(jnp.float32)
    yr = y_ref[pl.ds(start, 8), :].astype(jnp.float32)
    d = jnp.abs(xr - yr)
    if valid_rows is not None:  # static partial-chunk mask (ragged tail only)
        rows = jax.lax.broadcasted_iota(jnp.int32, d.shape, 0)
        d = jnp.where(rows < valid_rows, d, 0.0)
    out_ref[...] += d


def _make_kernel(tb, last_step_rows):
    """tb: rows per block (multiple of 8); last_step_rows: valid rows in the
    final grid step (1..tb; equals tb when bc divides evenly)."""
    full_chunks_per_step = tb // 8

    def kernel(x_ref, y_ref, out_ref):
        step = pl.program_id(0)

        @pl.when(step == 0)
        def _():
            out_ref[...] = jnp.zeros_like(out_ref)

        def run_full_chunks(n):
            if n <= 0:
                return

            @pl.loop(0, n)
            def _(r):
                start = pl.multiple_of(r * 8, 8)
                _accum_chunk(x_ref, y_ref, out_ref, start, None)

        if last_step_rows == tb:
            # Every step is full: no masking code emitted at all.
            run_full_chunks(full_chunks_per_step)
        else:
            last = pl.num_programs(0) - 1

            @pl.when(step != last)
            def _():
                run_full_chunks(full_chunks_per_step)

            @pl.when(step == last)
            def _():
                n_full = last_step_rows // 8
                run_full_chunks(n_full)
                tail = last_step_rows - n_full * 8
                if tail:
                    _accum_chunk(x_ref, y_ref, out_ref, n_full * 8, tail)

    return kernel


def latitude_loss(output, target):
    """output, target: (B, C, H, W) with H == 1040 (length of weights_lat).
    Stream inputs in their native dtype (bf16 welcome); upcast is in-kernel."""
    b, c, h, w = output.shape
    w_lat = _make_lat_weights()
    assert h == w_lat.shape[0], "h axis must match latitude weight length (1040)"

    bc = b * c
    l0 = h * w

    # ---- Generation-aware tile sizing --------------------------------------
    itemsize = jnp.dtype(output.dtype).itemsize
    row_bytes = l0 * itemsize                # one (b*c) row, native dtype
    acc_bytes = 8 * l0 * 4                   # resident f32 accumulator block

    try:
        vmem_phys = int(pltpu.get_tpu_info().vmem_capacity_bytes)
    except Exception:
        vmem_phys = 64 * 1024 * 1024         # v7x has the smallest VMEM

    # Budget ~70% of physical VMEM for 2 inputs x 2 pipeline buffers.
    stream_budget = int(vmem_phys * 0.7) - 2 * acc_bytes
    tb = (stream_budget // (4 * row_bytes)) // 8 * 8
    tb = int(max(8, min(tb, _TB_CAP)))
    tb = min(tb, ((bc + 7) // 8) * 8)        # no bigger than the problem

    steps = -(-bc // tb)
    last_step_rows = bc - (steps - 1) * tb   # 1..tb

    vmem_needed = 4 * tb * row_bytes + 2 * acc_bytes + (4 << 20)
    vmem_limit = int(min(max(vmem_needed, 16 << 20), int(vmem_phys * 0.9)))

    # ---- Flatten (free reshapes; NO wrapper-side padding copies) ------------
    x = output.reshape(bc, l0)
    y = target.reshape(bc, l0)

    partials = pl.pallas_call(
        _make_kernel(tb, last_step_rows),
        out_shape=jax.ShapeDtypeStruct((8, l0), jnp.float32),
        grid_spec=pltpu.PrefetchScalarGridSpec(
            num_scalar_prefetch=0,
            grid=(steps,),
            in_specs=[
                pl.BlockSpec((tb, l0), lambda i: (i, 0)),
                pl.BlockSpec((tb, l0), lambda i: (i, 0)),
            ],
            out_specs=pl.BlockSpec((8, l0), lambda i: (0, 0)),  # resident acc
        ),
        compiler_params=pltpu.CompilerParams(
            dimension_semantics=("arbitrary",),
            vmem_limit_bytes=vmem_limit,
        ),
    )(x, y)

    # Deferred latitude weight + single final reduce / mean (done once).
    w_flat = jnp.repeat(w_lat, w)            # weight per flattened (h, w) idx
    col_sums = jnp.sum(partials, axis=0)     # (l0,)
    n_total = jnp.float32(b * c * h * w)
    return jnp.sum(col_sums * w_flat) / n_total


def _reference(output, target):
    weights = _make_lat_weights()
    diff = jnp.abs(output.astype(jnp.float32) - target.astype(jnp.float32))
    weighted = diff * weights[None, None, :, None]
    return jnp.mean(weighted)


if __name__ == "__main__":
    key = jax.random.PRNGKey(0)
    k1, k2 = jax.random.split(key)
    # H must equal 1040 (the fixed latitude-weight length in the module).
    B, C, H, W = 2, 2, 1040, 8
    output = jax.random.normal(k1, (B, C, H, W), dtype=jnp.float32)
    target = jax.random.normal(k2, (B, C, H, W), dtype=jnp.float32)

    loss = latitude_loss(output, target)
    loss = jax.block_until_ready(loss)

    ref = jax.block_until_ready(_reference(output, target))
    np.testing.assert_allclose(np.asarray(loss), np.asarray(ref), rtol=1e-5, atol=1e-5)

    print("KERNEL_OK")
</pallas_src>

<mosaic_0001>
module attributes {stable_mosaic.version = 11 : i64} {
  func.func @kernel(%arg0: i32, %arg1: memref<8x8320xf32, #tpu.memory_space<vmem>>, %arg2: memref<8x8320xf32, #tpu.memory_space<vmem>>, %arg3: memref<8x8320xf32, #tpu.memory_space<vmem>>) attributes {dimension_semantics = [#tpu.dimension_semantics<arbitrary>], iteration_bounds = array<i64: 1>, scalar_prefetch = 0 : i64, scratch_operands = 0 : i64, tpu.core_type = #tpu.core_type<tc>, window_params = [{transform_indices = @transform_0, window_bounds = array<i64: 8, 8320>}, {transform_indices = @transform_1, window_bounds = array<i64: 8, 8320>}, {pipeline_mode = #tpu.pipeline_mode<synchronous>, transform_indices = @transform_2, window_bounds = array<i64: 8, 8320>}]} {
    %c0_i32 = arith.constant 0 : i32
    %0 = arith.cmpi eq, %arg0, %c0_i32 : i32
    %1 = arith.extui %0 : i1 to i32
    %c0_i32_0 = arith.constant 0 : i32
    %2 = arith.cmpi ne, %1, %c0_i32_0 : i32
    scf.if %2 {
      %cst = arith.constant 0.000000e+00 : f32
      %9 = vector.broadcast %cst : f32 to vector<8x8320xf32>
      %c0 = arith.constant 0 : index
      %c0_5 = arith.constant 0 : index
      %10 = vector.load %arg3[%c0, %c0_5] : memref<8x8320xf32, #tpu.memory_space<vmem>>, vector<8x8320xf32>
      tpu.vector_store %arg3[%c0, %c0_5], %9 {strides = array<i32>} : memref<8x8320xf32, #tpu.memory_space<vmem>>, vector<8x8320xf32>,
    } else {
    }
    %c0_i32_1 = arith.constant 0 : i32
    %3 = arith.cmpi ne, %arg0, %c0_i32_1 : i32
    %4 = arith.extui %3 : i1 to i32
    %c0_i32_2 = arith.constant 0 : i32
    %5 = arith.cmpi ne, %4, %c0_i32_2 : i32
    scf.if %5 {
      %c0_i32_5 = arith.constant 0 : i32
      %c1_i32 = arith.constant 1 : i32
      %9 = arith.muli %c0_i32_5, %c1_i32 : i32
      %c0_i32_6 = arith.constant 0 : i32
      %10 = arith.addi %c0_i32_6, %9 : i32
      %c8_i32 = arith.constant 8 : i32
      %11 = arith.muli %10, %c8_i32 : i32
      %12 = tpu.assume_multiple %11, 8 : i32
      %13 = arith.index_cast %12 : i32 to index
      %c0 = arith.constant 0 : index
      %14 = vector.load %arg1[%13, %c0] : memref<8x8320xf32, #tpu.memory_space<vmem>>, vector<8x8320xf32>
      %15 = arith.index_cast %12 : i32 to index
      %c0_7 = arith.constant 0 : index
      %16 = vector.load %arg2[%15, %c0_7] : memref<8x8320xf32, #tpu.memory_space<vmem>>, vector<8x8320xf32>
      %17 = arith.subf %14, %16 : vector<8x8320xf32>
      %18 = math.absf %17 : vector<8x8320xf32>
      %c0_8 = arith.constant 0 : index
      %c0_9 = arith.constant 0 : index
      %19 = vector.load %arg3[%c0_8, %c0_9] : memref<8x8320xf32, #tpu.memory_space<vmem>>, vector<8x8320xf32>
      %20 = arith.addf %19, %18 : vector<8x8320xf32>
      %c0_10 = arith.constant 0 : index
      %c0_11 = arith.constant 0 : index
      %21 = vector.load %arg3[%c0_10, %c0_11] : memref<8x8320xf32, #tpu.memory_space<vmem>>, vector<8x8320xf32>
      tpu.vector_store %arg3[%c0_10, %c0_11], %20 {strides = array<i32>} : memref<8x8320xf32, #tpu.memory_space<vmem>>, vector<8x8320xf32>,
      %c1_i32_12 = arith.constant 1 : i32
    } else {
    }
    %c0_i32_3 = arith.constant 0 : i32
    %6 = arith.cmpi eq, %arg0, %c0_i32_3 : i32
    %7 = arith.extui %6 : i1 to i32
    %c0_i32_4 = arith.constant 0 : i32
    %8 = arith.cmpi ne, %7, %c0_i32_4 : i32
    scf.if %8 {
      %c0 = arith.constant 0 : index
      %c0_5 = arith.constant 0 : index
      %9 = vector.load %arg1[%c0, %c0_5] : memref<8x8320xf32, #tpu.memory_space<vmem>>, vector<8x8320xf32>
      %c0_6 = arith.constant 0 : index
      %c0_7 = arith.constant 0 : index
      %10 = vector.load %arg2[%c0_6, %c0_7] : memref<8x8320xf32, #tpu.memory_space<vmem>>, vector<8x8320xf32>
      %11 = arith.subf %9, %10 : vector<8x8320xf32>
      %12 = math.absf %11 : vector<8x8320xf32>
      %13 = tpu.iota {dimensions = array<i32: 0>} : vector<8x8320xi32>
      %c4_i32 = arith.constant 4 : i32
      %14 = vector.broadcast %c4_i32 : i32 to vector<8x8320xi32>
      %15 = arith.cmpi slt, %13, %14 : vector<8x8320xi32>
      %cst = arith.constant 0.000000e+00 : f32
      %16 = vector.broadcast %cst : f32 to vector<8x8320xf32>
      %17 = arith.select %15, %12, %16 : vector<8x8320xi1>, vector<8x8320xf32>
      %c0_8 = arith.constant 0 : index
      %c0_9 = arith.constant 0 : index
      %18 = vector.load %arg3[%c0_8, %c0_9] : memref<8x8320xf32, #tpu.memory_space<vmem>>, vector<8x8320xf32>
      %19 = arith.addf %18, %17 : vector<8x8320xf32>
      %c0_10 = arith.constant 0 : index
      %c0_11 = arith.constant 0 : index
      %20 = vector.load %arg3[%c0_10, %c0_11] : memref<8x8320xf32, #tpu.memory_space<vmem>>, vector<8x8320xf32>
      tpu.vector_store %arg3[%c0_10, %c0_11], %19 {strides = array<i32>} : memref<8x8320xf32, #tpu.memory_space<vmem>>, vector<8x8320xf32>,
    } else {
    }
    return
  }
  func.func @transform_0(%arg0: i32) -> (i32, i32) {
    %c0_i32 = arith.constant 0 : i32
    %c0_i32_0 = arith.constant 0 : i32
    return %arg0, %c0_i32 : i32, i32
  }
  func.func @transform_1(%arg0: i32) -> (i32, i32) {
    %c0_i32 = arith.constant 0 : i32
    %c0_i32_0 = arith.constant 0 : i32
    return %arg0, %c0_i32 : i32, i32
  }
  func.func @transform_2(%arg0: i32) -> (i32, i32) {
    %c0_i32 = arith.constant 0 : i32
    %c0_i32_0 = arith.constant 0 : i32
    %c0_i32_1 = arith.constant 0 : i32
    return %c0_i32, %c0_i32_0 : i32, i32
  }
}

</mosaic_0001>

<bundles_post_ra>
// kernel: tpu_custom_call.1
= control target key start
LH: loop header
LB: loop body
LE: loop exit
PB: predicated region body
PF: predicated region fallthrough
CT: control target
= control target key end

     0   :  { %7 = vsyncpa [#allocation3], 0  ;;  %s1782_s0 = inlined_call_operand.hbm [shape: f32[4,8320], index: 0, kind: input, shape index: {}]   ;;  %s1783_s1 = inlined_call_operand.hbm [shape: f32[4,8320], index: 1, kind: input, shape index: {}]   ;;  %s1784_s2 = inlined_call_operand.hbm [shape: f32[8,8320], index: 2, kind: output, shape index: {}]  }
   0x1   :  { %8 = vsyncpa [#allocation6], 0 }
   0x2   :  { %9 = vsyncpa [#allocation4], 0 }
   0x3   :  { %14 = vsyncadd [#allocation3], 4160  ;;  %s1593_s9 = smov [#allocation2]   ;;  %s1521_s13 = scalar_lea.hbm %s1782_s0, 4160 }
   0x4   :  { %s15_s10 = sshll.u32 %s1593_s9, 4  ;;  %p1522_p0 = scmp.ne.s32.totalorder %s1782_s0, %s1521_s13  ;;  %s16_s10 = int_to_ptr.vmem [resolvable:$true] %s15_s10 }
   0x5   :  { %p1525_p1 = scmp.lt.u32.totalorder %s1521_s13, %s1782_s0 }
   0x7   :  { %p1527_p2 = pnand %p1525_p1, %p1522_p0 }
   0x9   :  { %1530 = shalt.err (!%p1527_p2)
}
   0xa   :  { %s1531_s18 = scalar_lea.vmem %s16_s10, 4160  ;;  %s1535_s19 = scalar_lea.vmem %s16_s10, 8320 }
   0xb   :  { %p1532_p3 = scmp.ne.s32.totalorder %s16_s10, %s1531_s18  ;;  %p1536_p4 = scmp.lt.s32.totalorder %s16_s10, %s16_s10 }
   0xc   :  { %p1537_p5 = scmp.lt.s32.totalorder %s1535_s19, %s1531_s18 }
   0xe   :  { %p1538_p6 = por %p1537_p5, %p1536_p4 }
  0x10   :  { %p1539_p7 = pnand %p1538_p6, %p1532_p3 }
  0x12   :  { %1542 = shalt.err (!%p1539_p7)
}
  0x13   :  { %s1594_s20 = smov 4160   ;;  %s1595_s21 = smov 260  }
  0x14   :  { %21 = dma.hbm_to_vmem [thread:$0]  %s1782_s0, 4160, %s16_s10, [#allocation3], %s1594_s20, %s1594_s20, %s1595_s21  }
  0x15   :  { %26 = vsyncadd [#allocation6], 4160  ;;  %s1596_s24 = smov [#allocation5]   ;;  %s1543_s28 = scalar_lea.hbm %s1783_s1, 4160 }
  0x16   :  { %s27_s25 = sshll.u32 %s1596_s24, 4  ;;  %p1544_p8 = scmp.ne.s32.totalorder %s1783_s1, %s1543_s28  ;;  %s28_s25 = int_to_ptr.vmem [resolvable:$true] %s27_s25 }
  0x17   :  { %p1547_p9 = scmp.lt.u32.totalorder %s1543_s28, %s1783_s1 }
  0x19   :  { %p1549_p10 = pnand %p1547_p9, %p1544_p8 }
  0x1b   :  { %1552 = shalt.err (!%p1549_p10)
}
  0x1c   :  { %s1553_s5 = scalar_lea.vmem %s28_s25, 4160  ;;  %s1557_s0 = scalar_lea.vmem %s28_s25, 8320 }
  0x1d   :  { %p1554_p11 = scmp.ne.s32.totalorder %s28_s25, %s1553_s5  ;;  %p1558_p12 = scmp.lt.s32.totalorder %s28_s25, %s28_s25 }
  0x1e   :  { %p1559_p13 = scmp.lt.s32.totalorder %s1557_s0, %s1553_s5 }
  0x20   :  { %p1560_p0 = por %p1559_p13, %p1558_p12 }
  0x22   :  { %p1561_p1 = pnand %p1560_p0, %p1554_p11 }
  0x24   :  { %1564 = shalt.err (!%p1561_p1)
}
  0x25   :  { %33 = dma.hbm_to_vmem [thread:$0]  %s1783_s1, 4160, %s28_s25, [#allocation6], %s1594_s20, %s1594_s20, %s1595_s21  }
  0x26   :  { %1587 = dma.done.wait [#allocation3], 8320  }
  0x27   :  { %1588 = vsyncadd [#allocation3], 4294958976 }
  0x28   :  { %1589 = dma.done.wait [#allocation6], 8320  }
  0x29   :  { %1590 = vsyncadd [#allocation6], 4294958976  ;;  %v1040_v0 = vlaneseq  ;;  %v776_v1 = vld [vmem:[#allocation2] sm:$0xff]  ;;  %v842_v3 = vld [vmem:[#allocation5] sm:$0xff]  ;;  %s1597_s1 = smov [#allocation7]  }
  0x2a   :  { %v809_v2 = vld [vmem:[#allocation2 + $0x104] sm:$0xff]  ;;  %v875_v4 = vld [vmem:[#allocation5 + $0x104] sm:$0xff]  ;;  %v908_v5 = vsub.f32 %v776_v1, %v842_v3  ;;  %v876_v11 = vld [vmem:[#allocation5 + $0x10c] sm:$0xff]  ;;  %s1505_s8 = sshll.u32 %s1597_s1, 4  ;;  %s1506_s8 = int_to_ptr.vmem [resolvable:$true] %s1505_s8 }
  0x2b   :  { %v1637_v6 = vshrl.u32 %v1040_v0, 7  ;;  %v777_v7 = vld [vmem:[#allocation2 + $0x8] sm:$0xff]  ;;  %v941_v9 = vsub.f32 %v809_v2, %v875_v4  ;;  %v843_v10 = vld [vmem:[#allocation5 + $0x8] sm:$0xff]  ;;  %v844_v17 = vld [vmem:[#allocation5 + $0x10] sm:$0xff]  ;;  %s1565_s9 = scalar_lea.vmem %s1506_s8, 8320  ;;  %p1570_p3 = scmp.lt.s32.totalorder %s1506_s8, %s1506_s8 }
  0x2c   :  { %v810_v8 = vld [vmem:[#allocation2 + $0x10c] sm:$0xff]  ;;  %v974_v13 = vand.u32 2147483647, %v908_v5  ;;  %v909_v14 = vsub.f32 %v777_v7, %v843_v10  ;;  %v811_v16 = vld [vmem:[#allocation2 + $0x114] sm:$0xff]  ;;  %v877_v18 = vld [vmem:[#allocation5 + $0x114] sm:$0xff]  ;;  %p1566_p2 = scmp.ne.s32.totalorder %s1506_s8, %s1565_s9  ;;  %p1571_p4 = scmp.lt.s32.totalorder %s1565_s9, %s1565_s9 }
  0x2d   :  { %v778_v12 = vld [vmem:[#allocation2 + $0x10] sm:$0xff]  ;;  %v942_v15 = vsub.f32 %v810_v8, %v876_v11  ;;  %v1007_v19 = vand.u32 2147483647, %v941_v9  ;;  %v943_v21 = vsub.f32 %v811_v16, %v877_v18  ;;  %v779_v22 = vld [vmem:[#allocation2 + $0x18] sm:$0xff]  ;;  %v845_v24 = vld [vmem:[#allocation5 + $0x18] sm:$0xff]  ;;  %vm1042_vm0 = vcmp.lt.s32.totalorder %v1637_v6, 4 }
  0x2e   :  { %v910_v20 = vsub.f32 %v778_v12, %v844_v17  ;;  %v812_v23 = vld [vmem:[#allocation2 + $0x11c] sm:$0xff]  ;;  %v975_v25 = vand.u32 2147483647, %v909_v14  ;;  %v878_v27 = vld [vmem:[#allocation5 + $0x11c] sm:$0xff]  ;;  %v911_v28 = vsub.f32 %v779_v22, %v845_v24  ;;  %v879_v40 = vld [vmem:[#allocation5 + $0x124] sm:$0xff]  ;;  %p1572_p5 = por %p1571_p4, %p1570_p3 }
  0x2f   :  { %v1008_v26 = vand.u32 2147483647, %v942_v15  ;;  %v1109_v29 = vcombine.low %v974_v13, %v1007_v19  ;;  %v1110_v30 = vcombine.high %v974_v13, %v1007_v19  ;;  %v1009_v32 = vand.u32 2147483647, %v943_v21  ;;  %v780_v33 = vld [vmem:[#allocation2 + $0x20] sm:$0xff]  ;;  %v846_v39 = vld [vmem:[#allocation5 + $0x20] sm:$0xff] }
  0x30   :  { %v976_v31 = vand.u32 2147483647, %v910_v20  ;;  %v944_v36 = vsub.f32 %v812_v23, %v878_v27  ;;  %v977_v37 = vand.u32 2147483647, %v911_v28  ;;  %v813_v38 = vld [vmem:[#allocation2 + $0x124] sm:$0xff]  ;;  %v814_v46 = vld [vmem:[#allocation2 + $0x12c] sm:$0xff]  ;;  %v912_v58 = vsub.f32 %v780_v33, %v846_v39  ;;  %p1573_p6 = pnand %p1572_p5, %p1566_p2 }
  0x31   :  { %v1111_v34 = vcombine.low %v975_v25, %v1008_v26  ;;  %v1112_v35 = vcombine.high %v975_v25, %v1008_v26  ;;  %v1239_v41 = vsel %vm1042_vm0, %v1109_v29, 0.0  ;;  %v1240_v42 = vsel %vm1042_vm0, %v1110_v30, 0.0  ;;  %v781_v45 = vld [vmem:[#allocation2 + $0x28] sm:$0xff]  ;;  %v847_v47 = vld [vmem:[#allocation5 + $0x28] sm:$0xff]  ;;  %v848_v52 = vld [vmem:[#allocation5 + $0x30] sm:$0xff] }
  0x32   :  { %v1113_v43 = vcombine.low %v976_v31, %v1009_v32  ;;  %v1114_v44 = vcombine.high %v976_v31, %v1009_v32  ;;  %v880_v50 = vld [vmem:[#allocation5 + $0x12c] sm:$0xff]  ;;  %v881_v56 = vld [vmem:[#allocation5 + $0x134] sm:$0xff]  ;;  %1434 = vst [vmem:[#allocation7] sm:$0xff] %v1239_v41  ;;  %1435 = vst [vmem:[#allocation7 + $0x8] sm:$0xff] %v1240_v42  ;;  %v1010_v57 = vand.u32 2147483647, %v944_v36  ;;  %v945_v61 = vsub.f32 %v813_v38, %v879_v40 }
  0x33   :  { %v1241_v48 = vsel %vm1042_vm0, %v1111_v34, 0.0  ;;  %v1242_v49 = vsel %vm1042_vm0, %v1112_v35, 0.0  ;;  %v782_v51 = vld [vmem:[#allocation2 + $0x30] sm:$0xff]  ;;  %v783_v59 = vld [vmem:[#allocation2 + $0x38] sm:$0xff]  ;;  %v849_v60 = vld [vmem:[#allocation5 + $0x38] sm:$0xff]  ;;  %v913_v62 = vsub.f32 %v781_v45, %v847_v47  ;;  %v946_v63 = vsub.f32 %v814_v46, %v880_v50 }
  0x34   :  { %v1243_v53 = vsel %vm1042_vm0, %v1113_v43, 0.0  ;;  %v1244_v54 = vsel %vm1042_vm0, %v1114_v44, 0.0  ;;  %v815_v55 = vld [vmem:[#allocation2 + $0x134] sm:$0xff]  ;;  %1436 = vst [vmem:[#allocation7 + $0x10] sm:$0xff] %v1241_v48  ;;  %1437 = vst [vmem:[#allocation7 + $0x18] sm:$0xff] %v1242_v49  ;;  %v914_v0 = vsub.f32 %v782_v51, %v848_v52  ;;  %v1115_v1 = vcombine.low %v977_v37, %v1010_v57  ;;  %v816_v5 = vld [vmem:[#allocation2 + $0x13c] sm:$0xff] }
  0x35   :  { %1438 = vst [vmem:[#allocation7 + $0x20] sm:$0xff] %v1243_v53  ;;  %1439 = vst [vmem:[#allocation7 + $0x28] sm:$0xff] %v1244_v54  ;;  %v1116_v2 = vcombine.high %v977_v37, %v1010_v57  ;;  %v978_v3 = vand.u32 2147483647, %v912_v58  ;;  %v947_v4 = vsub.f32 %v815_v55, %v881_v56  ;;  %v882_v7 = vld [vmem:[#allocation5 + $0x13c] sm:$0xff]  ;;  %v915_v11 = vsub.f32 %v783_v59, %v849_v60  ;;  %v883_v25 = vld [vmem:[#allocation5 + $0x144] sm:$0xff] }
  0x36   :  { %v1011_v8 = vand.u32 2147483647, %v945_v61  ;;  %v979_v9 = vand.u32 2147483647, %v913_v62  ;;  %v1012_v10 = vand.u32 2147483647, %v946_v63  ;;  %v948_v29 = vsub.f32 %v816_v5, %v882_v7 }
  0x37   :  { %v1245_v12 = vsel %vm1042_vm0, %v1115_v1, 0.0  ;;  %v1246_v13 = vsel %vm1042_vm0, %v1116_v2, 0.0  ;;  %v980_v14 = vand.u32 2147483647, %v914_v0  ;;  %v1013_v15 = vand.u32 2147483647, %v947_v4 }
  0x38   :  { %v1117_v16 = vcombine.low %v978_v3, %v1011_v8  ;;  %v1118_v17 = vcombine.high %v978_v3, %v1011_v8  ;;  %v784_v18 = vld [vmem:[#allocation2 + $0x40] sm:$0xff]  ;;  %v1119_v19 = vcombine.low %v979_v9, %v1012_v10  ;;  %v1120_v20 = vcombine.high %v979_v9, %v1012_v10  ;;  %v850_v24 = vld [vmem:[#allocation5 + $0x40] sm:$0xff]  ;;  %1440 = vst [vmem:[#allocation7 + $0x30] sm:$0xff] %v1245_v12  ;;  %v851_v32 = vld [vmem:[#allocation5 + $0x48] sm:$0xff] }
  0x39   :  { %v1121_v21 = vcombine.low %v980_v14, %v1013_v15  ;;  %v1122_v22 = vcombine.high %v980_v14, %v1013_v15  ;;  %v817_v23 = vld [vmem:[#allocation2 + $0x144] sm:$0xff]  ;;  %1441 = vst [vmem:[#allocation7 + $0x38] sm:$0xff] %v1246_v13  ;;  %v981_v30 = vand.u32 2147483647, %v915_v11  ;;  %v818_v31 = vld [vmem:[#allocation2 + $0x14c] sm:$0xff]  ;;  %v884_v35 = vld [vmem:[#allocation5 + $0x14c] sm:$0xff]  ;;  %v916_v43 = vsub.f32 %v784_v18, %v850_v24 }
  0x3a   :  { %v785_v26 = vld [vmem:[#allocation2 + $0x48] sm:$0xff]  ;;  %v1247_v27 = vsel %vm1042_vm0, %v1117_v16, 0.0  ;;  %v1248_v28 = vsel %vm1042_vm0, %v1118_v17, 0.0  ;;  %v1249_v33 = vsel %vm1042_vm0, %v1119_v19, 0.0  ;;  %v1250_v34 = vsel %vm1042_vm0, %v1120_v20, 0.0  ;;  %v786_v36 = vld [vmem:[#allocation2 + $0x50] sm:$0xff] }
  0x3b   :  { %v852_v37 = vld [vmem:[#allocation5 + $0x50] sm:$0xff]  ;;  %v1251_v38 = vsel %vm1042_vm0, %v1121_v21, 0.0  ;;  %v1252_v39 = vsel %vm1042_vm0, %v1122_v22, 0.0  ;;  %1442 = vst [vmem:[#allocation7 + $0x40] sm:$0xff] %v1247_v27  ;;  %1443 = vst [vmem:[#allocation7 + $0x48] sm:$0xff] %v1248_v28  ;;  %v853_v45 = vld [vmem:[#allocation5 + $0x58] sm:$0xff]  ;;  %v949_v46 = vsub.f32 %v817_v23, %v883_v25  ;;  %v917_v47 = vsub.f32 %v785_v26, %v851_v32 }
  0x3c   :  { %v819_v40 = vld [vmem:[#allocation2 + $0x154] sm:$0xff]  ;;  %v885_v41 = vld [vmem:[#allocation5 + $0x154] sm:$0xff]  ;;  %v1014_v42 = vand.u32 2147483647, %v948_v29  ;;  %1444 = vst [vmem:[#allocation7 + $0x50] sm:$0xff] %v1249_v33  ;;  %1445 = vst [vmem:[#allocation7 + $0x58] sm:$0xff] %v1250_v34  ;;  %v950_v48 = vsub.f32 %v818_v31, %v884_v35  ;;  %v918_v49 = vsub.f32 %v786_v36, %v852_v37 }
  0x3d   :  { %v787_v44 = vld [vmem:[#allocation2 + $0x58] sm:$0xff]  ;;  %1446 = vst [vmem:[#allocation7 + $0x60] sm:$0xff] %v1251_v38  ;;  %1447 = vst [vmem:[#allocation7 + $0x68] sm:$0xff] %v1252_v39  ;;  %v982_v52 = vand.u32 2147483647, %v916_v43  ;;  %v951_v53 = vsub.f32 %v819_v40, %v885_v41  ;;  %v886_v55 = vld [vmem:[#allocation5 + $0x15c] sm:$0xff] }
  0x3e   :  { %v1123_v50 = vcombine.low %v981_v30, %v1014_v42  ;;  %v1124_v51 = vcombine.high %v981_v30, %v1014_v42  ;;  %v820_v54 = vld [vmem:[#allocation2 + $0x15c] sm:$0xff]  ;;  %v1015_v56 = vand.u32 2147483647, %v949_v46  ;;  %v983_v57 = vand.u32 2147483647, %v917_v47  ;;  %v821_v8 = vld [vmem:[#allocation2 + $0x164] sm:$0xff] }
  0x3f   :  { %v1016_v58 = vand.u32 2147483647, %v950_v48  ;;  %v919_v59 = vsub.f32 %v787_v44, %v853_v45  ;;  %v984_v62 = vand.u32 2147483647, %v918_v49  ;;  %v1017_v63 = vand.u32 2147483647, %v951_v53 }
  0x40   :  { %v1253_v60 = vsel %vm1042_vm0, %v1123_v50, 0.0  ;;  %v1254_v61 = vsel %vm1042_vm0, %v1124_v51, 0.0  ;;  %v1125_v0 = vcombine.low %v982_v52, %v1015_v56  ;;  %v1126_v1 = vcombine.high %v982_v52, %v1015_v56  ;;  %v788_v2 = vld [vmem:[#allocation2 + $0x60] sm:$0xff]  ;;  %v854_v9 = vld [vmem:[#allocation5 + $0x60] sm:$0xff]  ;;  %v855_v17 = vld [vmem:[#allocation5 + $0x68] sm:$0xff] }
  0x41   :  { %v1127_v3 = vcombine.low %v983_v57, %v1016_v58  ;;  %v1128_v4 = vcombine.high %v983_v57, %v1016_v58  ;;  %v1129_v5 = vcombine.low %v984_v62, %v1017_v63  ;;  %v1130_v7 = vcombine.high %v984_v62, %v1017_v63  ;;  %v887_v10 = vld [vmem:[#allocation5 + $0x164] sm:$0xff]  ;;  %1448 = vst [vmem:[#allocation7 + $0x70] sm:$0xff] %v1253_v60  ;;  %v888_v20 = vld [vmem:[#allocation5 + $0x16c] sm:$0xff]  ;;  %v889_v26 = vld [vmem:[#allocation5 + $0x174] sm:$0xff] }
  0x42   :  { %v789_v11 = vld [vmem:[#allocation2 + $0x68] sm:$0xff]  ;;  %1449 = vst [vmem:[#allocation7 + $0x78] sm:$0xff] %v1254_v61  ;;  %v1255_v12 = vsel %vm1042_vm0, %v1125_v0, 0.0  ;;  %v1256_v13 = vsel %vm1042_vm0, %v1126_v1, 0.0  ;;  %v952_v14 = vsub.f32 %v820_v54, %v886_v55  ;;  %v985_v15 = vand.u32 2147483647, %v919_v59 }
  0x43   :  { %v822_v16 = vld [vmem:[#allocation2 + $0x16c] sm:$0xff]  ;;  %v1257_v18 = vsel %vm1042_vm0, %v1127_v3, 0.0  ;;  %v1258_v19 = vsel %vm1042_vm0, %v1128_v4, 0.0  ;;  %v856_v22 = vld [vmem:[#allocation5 + $0x70] sm:$0xff]  ;;  %v1259_v23 = vsel %vm1042_vm0, %v1129_v5, 0.0  ;;  %v1260_v24 = vsel %vm1042_vm0, %v1130_v7, 0.0 }
  0x44   :  { %v790_v21 = vld [vmem:[#allocation2 + $0x70] sm:$0xff]  ;;  %1450 = vst [vmem:[#allocation7 + $0x80] sm:$0xff] %v1255_v12  ;;  %1451 = vst [vmem:[#allocation7 + $0x88] sm:$0xff] %v1256_v13  ;;  %v1018_v27 = vand.u32 2147483647, %v952_v14  ;;  %v920_v28 = vsub.f32 %v788_v2, %v854_v9  ;;  %v791_v29 = vld [vmem:[#allocation2 + $0x78] sm:$0xff]  ;;  %v953_v31 = vsub.f32 %v821_v8, %v887_v10  ;;  %v921_v32 = vsub.f32 %v789_v11, %v855_v17 }
  0x45   :  { %v823_v25 = vld [vmem:[#allocation2 + $0x174] sm:$0xff]  ;;  %v857_v30 = vld [vmem:[#allocation5 + $0x78] sm:$0xff]  ;;  %1452 = vst [vmem:[#allocation7 + $0x90] sm:$0xff] %v1257_v18  ;;  %1453 = vst [vmem:[#allocation7 + $0x98] sm:$0xff] %v1258_v19  ;;  %v954_v33 = vsub.f32 %v822_v16, %v888_v20  ;;  %v922_v34 = vsub.f32 %v790_v21, %v856_v22 }
  0x46   :  { %1454 = vst [vmem:[#allocation7 + $0xa0] sm:$0xff] %v1259_v23  ;;  %1455 = vst [vmem:[#allocation7 + $0xa8] sm:$0xff] %v1260_v24  ;;  %v1131_v35 = vcombine.low %v985_v15, %v1018_v27  ;;  %v1132_v36 = vcombine.high %v985_v15, %v1018_v27  ;;  %v986_v37 = vand.u32 2147483647, %v920_v28  ;;  %v955_v38 = vsub.f32 %v823_v25, %v889_v26  ;;  %v824_v39 = vld [vmem:[#allocation2 + $0x17c] sm:$0xff]  ;;  %v890_v40 = vld [vmem:[#allocation5 + $0x17c] sm:$0xff] }
  0x47   :  { %v1019_v41 = vand.u32 2147483647, %v953_v31  ;;  %v987_v42 = vand.u32 2147483647, %v921_v32  ;;  %v1020_v43 = vand.u32 2147483647, %v954_v33  ;;  %v923_v44 = vsub.f32 %v791_v29, %v857_v30 }
  0x48   :  { %v1261_v45 = vsel %vm1042_vm0, %v1131_v35, 0.0  ;;  %v1262_v46 = vsel %vm1042_vm0, %v1132_v36, 0.0  ;;  %v988_v47 = vand.u32 2147483647, %v922_v34  ;;  %v1021_v48 = vand.u32 2147483647, %v955_v38 }
  0x49   :  { %v1133_v49 = vcombine.low %v986_v37, %v1019_v41  ;;  %v1134_v50 = vcombine.high %v986_v37, %v1019_v41  ;;  %v792_v51 = vld [vmem:[#allocation2 + $0x80] sm:$0xff]  ;;  %v1135_v52 = vcombine.low %v987_v42, %v1020_v43  ;;  %v1136_v53 = vcombine.high %v987_v42, %v1020_v43  ;;  %v858_v57 = vld [vmem:[#allocation5 + $0x80] sm:$0xff]  ;;  %1456 = vst [vmem:[#allocation7 + $0xb0] sm:$0xff] %v1261_v45  ;;  %v859_v1 = vld [vmem:[#allocation5 + $0x88] sm:$0xff] }
  0x4a   :  { %v1137_v54 = vcombine.low %v988_v47, %v1021_v48  ;;  %v1138_v55 = vcombine.high %v988_v47, %v1021_v48  ;;  %v825_v56 = vld [vmem:[#allocation2 + $0x184] sm:$0xff]  ;;  %v891_v58 = vld [vmem:[#allocation5 + $0x184] sm:$0xff]  ;;  %1457 = vst [vmem:[#allocation7 + $0xb8] sm:$0xff] %v1262_v46  ;;  %v956_v62 = vsub.f32 %v824_v39, %v890_v40  ;;  %v989_v63 = vand.u32 2147483647, %v923_v44  ;;  %v892_v4 = vld [vmem:[#allocation5 + $0x18c] sm:$0xff] }
  0x4b   :  { %v793_v59 = vld [vmem:[#allocation2 + $0x88] sm:$0xff]  ;;  %v1263_v60 = vsel %vm1042_vm0, %v1133_v49, 0.0  ;;  %v1264_v61 = vsel %vm1042_vm0, %v1134_v50, 0.0  ;;  %v1265_v2 = vsel %vm1042_vm0, %v1135_v52, 0.0  ;;  %v1266_v3 = vsel %vm1042_vm0, %v1136_v53, 0.0  ;;  %v794_v5 = vld [vmem:[#allocation2 + $0x90] sm:$0xff] }
  0x4c   :  { %v826_v0 = vld [vmem:[#allocation2 + $0x18c] sm:$0xff]  ;;  %v860_v7 = vld [vmem:[#allocation5 + $0x90] sm:$0xff]  ;;  %v1267_v8 = vsel %vm1042_vm0, %v1137_v54, 0.0  ;;  %v1268_v9 = vsel %vm1042_vm0, %v1138_v55, 0.0  ;;  %1458 = vst [vmem:[#allocation7 + $0xc0] sm:$0xff] %v1263_v60  ;;  %1459 = vst [vmem:[#allocation7 + $0xc8] sm:$0xff] %v1264_v61  ;;  %v924_v13 = vsub.f32 %v792_v51, %v858_v57  ;;  %v957_v16 = vsub.f32 %v825_v56, %v891_v58 }
  0x4d   :  { %v827_v10 = vld [vmem:[#allocation2 + $0x194] sm:$0xff]  ;;  %v893_v11 = vld [vmem:[#allocation5 + $0x194] sm:$0xff]  ;;  %v1022_v12 = vand.u32 2147483647, %v956_v62  ;;  %1460 = vst [vmem:[#allocation7 + $0xd0] sm:$0xff] %v1265_v2  ;;  %1461 = vst [vmem:[#allocation7 + $0xd8] sm:$0xff] %v1266_v3  ;;  %v925_v17 = vsub.f32 %v793_v59, %v859_v1  ;;  %v958_v18 = vsub.f32 %v826_v0, %v892_v4  ;;  %v926_v19 = vsub.f32 %v794_v5, %v860_v7 }
  0x4e   :  { %v795_v14 = vld [vmem:[#allocation2 + $0x98] sm:$0xff]  ;;  %v861_v15 = vld [vmem:[#allocation5 + $0x98] sm:$0xff]  ;;  %1462 = vst [vmem:[#allocation7 + $0xe0] sm:$0xff] %v1267_v8  ;;  %1463 = vst [vmem:[#allocation7 + $0xe8] sm:$0xff] %v1268_v9  ;;  %v990_v22 = vand.u32 2147483647, %v924_v13  ;;  %v959_v23 = vsub.f32 %v827_v10, %v893_v11 }
  0x4f   :  { %v1139_v20 = vcombine.low %v989_v63, %v1022_v12  ;;  %v1140_v21 = vcombine.high %v989_v63, %v1022_v12  ;;  %v828_v24 = vld [vmem:[#allocation2 + $0x19c] sm:$0xff]  ;;  %v894_v25 = vld [vmem:[#allocation5 + $0x19c] sm:$0xff]  ;;  %v1023_v26 = vand.u32 2147483647, %v957_v16  ;;  %v991_v27 = vand.u32 2147483647, %v925_v17 }
  0x50   :  { %v1024_v28 = vand.u32 2147483647, %v958_v18  ;;  %v927_v29 = vsub.f32 %v795_v14, %v861_v15  ;;  %v992_v32 = vand.u32 2147483647, %v926_v19  ;;  %v1025_v33 = vand.u32 2147483647, %v959_v23 }
  0x51   :  { %v1269_v30 = vsel %vm1042_vm0, %v1139_v20, 0.0  ;;  %v1270_v31 = vsel %vm1042_vm0, %v1140_v21, 0.0  ;;  %v1141_v34 = vcombine.low %v990_v22, %v1023_v26  ;;  %v1142_v35 = vcombine.high %v990_v22, %v1023_v26  ;;  %v796_v36 = vld [vmem:[#allocation2 + $0xa0] sm:$0xff]  ;;  %v862_v42 = vld [vmem:[#allocation5 + $0xa0] sm:$0xff]  ;;  %v863_v50 = vld [vmem:[#allocation5 + $0xa8] sm:$0xff] }
  0x52   :  { %v1143_v37 = vcombine.low %v991_v27, %v1024_v28  ;;  %v1144_v38 = vcombine.high %v991_v27, %v1024_v28  ;;  %v1145_v39 = vcombine.low %v992_v32, %v1025_v33  ;;  %v1146_v40 = vcombine.high %v992_v32, %v1025_v33  ;;  %v829_v41 = vld [vmem:[#allocation2 + $0x1a4] sm:$0xff]  ;;  %v895_v43 = vld [vmem:[#allocation5 + $0x1a4] sm:$0xff]  ;;  %1464 = vst [vmem:[#allocation7 + $0xf0] sm:$0xff] %v1269_v30  ;;  %v896_v53 = vld [vmem:[#allocation5 + $0x1ac] sm:$0xff] }
  0x53   :  { %v797_v44 = vld [vmem:[#allocation2 + $0xa8] sm:$0xff]  ;;  %1465 = vst [vmem:[#allocation7 + $0xf8] sm:$0xff] %v1270_v31  ;;  %v1271_v45 = vsel %vm1042_vm0, %v1141_v34, 0.0  ;;  %v1272_v46 = vsel %vm1042_vm0, %v1142_v35, 0.0  ;;  %v960_v47 = vsub.f32 %v828_v24, %v894_v25  ;;  %v993_v48 = vand.u32 2147483647, %v927_v29 }
  0x54   :  { %v830_v49 = vld [vmem:[#allocation2 + $0x1ac] sm:$0xff]  ;;  %v1273_v51 = vsel %vm1042_vm0, %v1143_v37, 0.0  ;;  %v1274_v52 = vsel %vm1042_vm0, %v1144_v38, 0.0  ;;  %v864_v55 = vld [vmem:[#allocation5 + $0xb0] sm:$0xff]  ;;  %v1275_v56 = vsel %vm1042_vm0, %v1145_v39, 0.0  ;;  %v1276_v57 = vsel %vm1042_vm0, %v1146_v40, 0.0 }
  0x55   :  { %v798_v54 = vld [vmem:[#allocation2 + $0xb0] sm:$0xff]  ;;  %v897_v59 = vld [vmem:[#allocation5 + $0x1b4] sm:$0xff]  ;;  %1466 = vst [vmem:[#allocation7 + $0x100] sm:$0xff] %v1271_v45  ;;  %1467 = vst [vmem:[#allocation7 + $0x108] sm:$0xff] %v1272_v46  ;;  %v1026_v60 = vand.u32 2147483647, %v960_v47  ;;  %v928_v61 = vsub.f32 %v796_v36, %v862_v42  ;;  %v961_v0 = vsub.f32 %v829_v41, %v895_v43  ;;  %v929_v1 = vsub.f32 %v797_v44, %v863_v50 }
  0x56   :  { %v831_v58 = vld [vmem:[#allocation2 + $0x1b4] sm:$0xff]  ;;  %v865_v63 = vld [vmem:[#allocation5 + $0xb8] sm:$0xff]  ;;  %1468 = vst [vmem:[#allocation7 + $0x110] sm:$0xff] %v1273_v51  ;;  %1469 = vst [vmem:[#allocation7 + $0x118] sm:$0xff] %v1274_v52  ;;  %v962_v2 = vsub.f32 %v830_v49, %v896_v53  ;;  %v930_v3 = vsub.f32 %v798_v54, %v864_v55 }
  0x57   :  { %v799_v62 = vld [vmem:[#allocation2 + $0xb8] sm:$0xff]  ;;  %1470 = vst [vmem:[#allocation7 + $0x120] sm:$0xff] %v1275_v56  ;;  %1471 = vst [vmem:[#allocation7 + $0x128] sm:$0xff] %v1276_v57  ;;  %v1147_v4 = vcombine.low %v993_v48, %v1026_v60  ;;  %v1148_v5 = vcombine.high %v993_v48, %v1026_v60  ;;  %v994_v7 = vand.u32 2147483647, %v928_v61  ;;  %v963_v8 = vsub.f32 %v831_v58, %v897_v59  ;;  %v898_v10 = vld [vmem:[#allocation5 + $0x1bc] sm:$0xff] }
  0x58   :  { %v832_v9 = vld [vmem:[#allocation2 + $0x1bc] sm:$0xff]  ;;  %v1027_v11 = vand.u32 2147483647, %v961_v0  ;;  %v995_v12 = vand.u32 2147483647, %v929_v1  ;;  %v931_v14 = vsub.f32 %v799_v62, %v865_v63  ;;  %v833_v26 = vld [vmem:[#allocation2 + $0x1c4] sm:$0xff] }
  0x59   :  { %v1028_v13 = vand.u32 2147483647, %v962_v2  ;;  %v1277_v15 = vsel %vm1042_vm0, %v1147_v4, 0.0  ;;  %v1278_v16 = vsel %vm1042_vm0, %v1148_v5, 0.0  ;;  %v996_v17 = vand.u32 2147483647, %v930_v3 }
  0x5a   :  { %v1029_v18 = vand.u32 2147483647, %v963_v8  ;;  %v1149_v19 = vcombine.low %v994_v7, %v1027_v11  ;;  %v1150_v20 = vcombine.high %v994_v7, %v1027_v11  ;;  %v800_v21 = vld [vmem:[#allocation2 + $0xc0] sm:$0xff]  ;;  %v866_v27 = vld [vmem:[#allocation5 + $0xc0] sm:$0xff]  ;;  %1472 = vst [vmem:[#allocation7 + $0x130] sm:$0xff] %v1277_v15  ;;  %1473 = vst [vmem:[#allocation7 + $0x138] sm:$0xff] %v1278_v16  ;;  %v964_v32 = vsub.f32 %v832_v9, %v898_v10 }
  0x5b   :  { %v1151_v22 = vcombine.low %v995_v12, %v1028_v13  ;;  %v1152_v23 = vcombine.high %v995_v12, %v1028_v13  ;;  %v899_v28 = vld [vmem:[#allocation5 + $0x1c4] sm:$0xff]  ;;  %v997_v33 = vand.u32 2147483647, %v931_v14  ;;  %v900_v38 = vld [vmem:[#allocation5 + $0x1cc] sm:$0xff]  ;;  %v901_v44 = vld [vmem:[#allocation5 + $0x1d4] sm:$0xff]  ;;  %v932_v46 = vsub.f32 %v800_v21, %v866_v27 }
  0x5c   :  { %v1153_v24 = vcombine.low %v996_v17, %v1029_v18  ;;  %v1154_v25 = vcombine.high %v996_v17, %v1029_v18  ;;  %v801_v29 = vld [vmem:[#allocation2 + $0xc8] sm:$0xff]  ;;  %v1279_v30 = vsel %vm1042_vm0, %v1149_v19, 0.0  ;;  %v1280_v31 = vsel %vm1042_vm0, %v1150_v20, 0.0  ;;  %v867_v35 = vld [vmem:[#allocation5 + $0xc8] sm:$0xff]  ;;  %v868_v40 = vld [vmem:[#allocation5 + $0xd0] sm:$0xff] }
  0x5d   :  { %v834_v34 = vld [vmem:[#allocation2 + $0x1cc] sm:$0xff]  ;;  %v1281_v36 = vsel %vm1042_vm0, %v1151_v22, 0.0  ;;  %v1282_v37 = vsel %vm1042_vm0, %v1152_v23, 0.0  ;;  %v835_v43 = vld [vmem:[#allocation2 + $0x1d4] sm:$0xff]  ;;  %1474 = vst [vmem:[#allocation7 + $0x140] sm:$0xff] %v1279_v30  ;;  %1475 = vst [vmem:[#allocation7 + $0x148] sm:$0xff] %v1280_v31  ;;  %v965_v49 = vsub.f32 %v833_v26, %v899_v28  ;;  %v933_v50 = vsub.f32 %v801_v29, %v867_v35 }
  0x5e   :  { %v802_v39 = vld [vmem:[#allocation2 + $0xd0] sm:$0xff]  ;;  %v1283_v41 = vsel %vm1042_vm0, %v1153_v24, 0.0  ;;  %v1284_v42 = vsel %vm1042_vm0, %v1154_v25, 0.0  ;;  %v1030_v45 = vand.u32 2147483647, %v964_v32  ;;  %v803_v47 = vld [vmem:[#allocation2 + $0xd8] sm:$0xff]  ;;  %v966_v51 = vsub.f32 %v834_v34, %v900_v38 }
  0x5f   :  { %v869_v48 = vld [vmem:[#allocation5 + $0xd8] sm:$0xff]  ;;  %1476 = vst [vmem:[#allocation7 + $0x150] sm:$0xff] %v1281_v36  ;;  %1477 = vst [vmem:[#allocation7 + $0x158] sm:$0xff] %v1282_v37  ;;  %v934_v52 = vsub.f32 %v802_v39, %v868_v40  ;;  %v998_v55 = vand.u32 2147483647, %v932_v46  ;;  %v967_v56 = vsub.f32 %v835_v43, %v901_v44  ;;  %v870_v12 = vld [vmem:[#allocation5 + $0xe0] sm:$0xff] }
  0x60   :  { %1478 = vst [vmem:[#allocation7 + $0x160] sm:$0xff] %v1283_v41  ;;  %1479 = vst [vmem:[#allocation7 + $0x168] sm:$0xff] %v1284_v42  ;;  %v1155_v53 = vcombine.low %v997_v33, %v1030_v45  ;;  %v1156_v54 = vcombine.high %v997_v33, %v1030_v45  ;;  %v836_v57 = vld [vmem:[#allocation2 + $0x1dc] sm:$0xff]  ;;  %v902_v58 = vld [vmem:[#allocation5 + $0x1dc] sm:$0xff]  ;;  %v1031_v59 = vand.u32 2147483647, %v965_v49  ;;  %v935_v62 = vsub.f32 %v803_v47, %v869_v48 }
  0x61   :  { %v999_v60 = vand.u32 2147483647, %v933_v50  ;;  %v1032_v61 = vand.u32 2147483647, %v966_v51  ;;  %v1000_v1 = vand.u32 2147483647, %v934_v52  ;;  %v968_v17 = vsub.f32 %v836_v57, %v902_v58 }
  0x62   :  { %v1285_v63 = vsel %vm1042_vm0, %v1155_v53, 0.0  ;;  %v1286_v0 = vsel %vm1042_vm0, %v1156_v54, 0.0  ;;  %v1033_v2 = vand.u32 2147483647, %v967_v56  ;;  %v1157_v3 = vcombine.low %v998_v55, %v1031_v59  ;;  %v804_v5 = vld [vmem:[#allocation2 + $0xe0] sm:$0xff]  ;;  %v903_v13 = vld [vmem:[#allocation5 + $0x1e4] sm:$0xff] }
  0x63   :  { %v1158_v4 = vcombine.high %v998_v55, %v1031_v59  ;;  %v1159_v7 = vcombine.low %v999_v60, %v1032_v61  ;;  %v1160_v8 = vcombine.high %v999_v60, %v1032_v61  ;;  %v837_v11 = vld [vmem:[#allocation2 + $0x1e4] sm:$0xff]  ;;  %1480 = vst [vmem:[#allocation7 + $0x170] sm:$0xff] %v1285_v63  ;;  %1481 = vst [vmem:[#allocation7 + $0x178] sm:$0xff] %v1286_v0  ;;  %v1001_v18 = vand.u32 2147483647, %v935_v62  ;;  %v838_v19 = vld [vmem:[#allocation2 + $0x1ec] sm:$0xff] }
  0x64   :  { %v1161_v9 = vcombine.low %v1000_v1, %v1033_v2  ;;  %v1162_v10 = vcombine.high %v1000_v1, %v1033_v2  ;;  %v805_v14 = vld [vmem:[#allocation2 + $0xe8] sm:$0xff]  ;;  %v1287_v15 = vsel %vm1042_vm0, %v1157_v3, 0.0  ;;  %v871_v20 = vld [vmem:[#allocation5 + $0xe8] sm:$0xff]  ;;  %v872_v25 = vld [vmem:[#allocation5 + $0xf0] sm:$0xff]  ;;  %v1034_v30 = vand.u32 2147483647, %v968_v17 }
  0x65   :  { %v1288_v16 = vsel %vm1042_vm0, %v1158_v4, 0.0  ;;  %v1289_v21 = vsel %vm1042_vm0, %v1159_v7, 0.0  ;;  %v1290_v22 = vsel %vm1042_vm0, %v1160_v8, 0.0  ;;  %v904_v23 = vld [vmem:[#allocation5 + $0x1ec] sm:$0xff]  ;;  %v905_v29 = vld [vmem:[#allocation5 + $0x1f4] sm:$0xff]  ;;  %1482 = vst [vmem:[#allocation7 + $0x180] sm:$0xff] %v1287_v15  ;;  %v936_v31 = vsub.f32 %v804_v5, %v870_v12 }
  0x66   :  { %v806_v24 = vld [vmem:[#allocation2 + $0xf0] sm:$0xff]  ;;  %v1291_v26 = vsel %vm1042_vm0, %v1161_v9, 0.0  ;;  %v1292_v27 = vsel %vm1042_vm0, %v1162_v10, 0.0  ;;  %1483 = vst [vmem:[#allocation7 + $0x188] sm:$0xff] %v1288_v16  ;;  %v807_v32 = vld [vmem:[#allocation2 + $0xf8] sm:$0xff]  ;;  %v873_v33 = vld [vmem:[#allocation5 + $0xf8] sm:$0xff]  ;;  %v969_v34 = vsub.f32 %v837_v11, %v903_v13  ;;  %v937_v35 = vsub.f32 %v805_v14, %v871_v20 }
  0x67   :  { %v839_v28 = vld [vmem:[#allocation2 + $0x1f4] sm:$0xff]  ;;  %1484 = vst [vmem:[#allocation7 + $0x190] sm:$0xff] %v1289_v21  ;;  %1485 = vst [vmem:[#allocation7 + $0x198] sm:$0xff] %v1290_v22  ;;  %v970_v36 = vsub.f32 %v838_v19, %v904_v23  ;;  %v938_v37 = vsub.f32 %v806_v24, %v872_v25  ;;  %v1163_v38 = vcombine.low %v1001_v18, %v1034_v30  ;;  %v1002_v40 = vand.u32 2147483647, %v936_v31  ;;  %v840_v42 = vld [vmem:[#allocation2 + $0x1fc] sm:$0xff] }
  0x68   :  { %1486 = vst [vmem:[#allocation7 + $0x1a0] sm:$0xff] %v1291_v26  ;;  %1487 = vst [vmem:[#allocation7 + $0x1a8] sm:$0xff] %v1292_v27  ;;  %v1164_v39 = vcombine.high %v1001_v18, %v1034_v30  ;;  %v971_v41 = vsub.f32 %v839_v28, %v905_v29  ;;  %v906_v43 = vld [vmem:[#allocation5 + $0x1fc] sm:$0xff]  ;;  %v1035_v44 = vand.u32 2147483647, %v969_v34  ;;  %v939_v47 = vsub.f32 %v807_v32, %v873_v33 }
  0x69   :  { %v1003_v45 = vand.u32 2147483647, %v937_v35  ;;  %v1036_v46 = vand.u32 2147483647, %v970_v36  ;;  %v1293_v48 = vsel %vm1042_vm0, %v1163_v38, 0.0  ;;  %v972_v61 = vsub.f32 %v840_v42, %v906_v43 }
  0x6a   :  { %v1294_v49 = vsel %vm1042_vm0, %v1164_v39, 0.0  ;;  %v1004_v50 = vand.u32 2147483647, %v938_v37  ;;  %v1037_v51 = vand.u32 2147483647, %v971_v41  ;;  %v1165_v52 = vcombine.low %v1002_v40, %v1035_v44  ;;  %1488 = vst [vmem:[#allocation7 + $0x1b0] sm:$0xff] %v1293_v48 }
  0x6b   :  { %v1166_v53 = vcombine.high %v1002_v40, %v1035_v44  ;;  %v1167_v54 = vcombine.low %v1003_v45, %v1036_v46  ;;  %v1168_v55 = vcombine.high %v1003_v45, %v1036_v46  ;;  %v808_v58 = vld [vmem:[#allocation2 + $0x100] sm:$0xf]  ;;  %1489 = vst [vmem:[#allocation7 + $0x1b8] sm:$0xff] %v1294_v49  ;;  %v1005_v62 = vand.u32 2147483647, %v939_v47 }
  0x6c   :  { %v1169_v56 = vcombine.low %v1004_v50, %v1037_v51  ;;  %v1170_v57 = vcombine.high %v1004_v50, %v1037_v51  ;;  %v1295_v59 = vsel %vm1042_vm0, %v1165_v52, 0.0  ;;  %v874_v63 = vld [vmem:[#allocation5 + $0x100] sm:$0xf]  ;;  %v841_v2 = vld [vmem:[#allocation2 + $0x204] sm:$0xf] }
  0x6d   :  { %v1296_v60 = vsel %vm1042_vm0, %v1166_v53, 0.0  ;;  %v1297_v0 = vsel %vm1042_vm0, %v1167_v54, 0.0  ;;  %v1298_v1 = vsel %vm1042_vm0, %v1168_v55, 0.0  ;;  %v907_v3 = vld [vmem:[#allocation5 + $0x204] sm:$0xf]  ;;  %1490 = vst [vmem:[#allocation7 + $0x1c0] sm:$0xff] %v1295_v59  ;;  %v940_v8 = vsub.f32 %v808_v58, %v874_v63 }
  0x6e   :  { %v1299_v4 = vsel %vm1042_vm0, %v1169_v56, 0.0  ;;  %v1300_v5 = vsel %vm1042_vm0, %v1170_v57, 0.0  ;;  %1491 = vst [vmem:[#allocation7 + $0x1c8] sm:$0xff] %v1296_v60  ;;  %v1038_v7 = vand.u32 2147483647, %v972_v61  ;;  %1492 = vst [vmem:[#allocation7 + $0x1d0] sm:$0xff] %v1297_v0  ;;  %v973_v9 = vsub.f32 %v841_v2, %v907_v3 }
  0x6f   :  { %1493 = vst [vmem:[#allocation7 + $0x1d8] sm:$0xff] %v1298_v1  ;;  %1494 = vst [vmem:[#allocation7 + $0x1e0] sm:$0xff] %v1299_v4  ;;  %v1006_v12 = vand.u32 2147483647, %v940_v8 }
  0x70   :  { %1495 = vst [vmem:[#allocation7 + $0x1e8] sm:$0xff] %v1300_v5  ;;  %v1171_v10 = vcombine.low %v1005_v62, %v1038_v7  ;;  %v1172_v11 = vcombine.high %v1005_v62, %v1038_v7  ;;  %v1039_v13 = vand.u32 2147483647, %v973_v9 }
  0x72   :  { %v1301_v14 = vsel %vm1042_vm0, %v1171_v10, 0.0  ;;  %v1302_v15 = vsel %vm1042_vm0, %v1172_v11, 0.0  ;;  %v1173_v16 = vcombine.low %v1006_v12, %v1039_v13 }
  0x73   :  { %1496 = vst [vmem:[#allocation7 + $0x1f0] sm:$0xff] %v1301_v14  ;;  %1497 = vst [vmem:[#allocation7 + $0x1f8] sm:$0xff] %v1302_v15 }
  0x74   :  { %v1303_v17 = vsel %vm1042_vm0, %v1173_v16, 0.0 }
  0x75   :  { %1498 = vst [vmem:[#allocation7 + $0x200] sm:$0xff] %v1303_v17 }
  0x76   :  { %1576 = shalt.err (!%p1573_p6)
}
  0x77   :  { %s1577_s12 = scalar_lea.hbm %s1784_s2, 8320 }
  0x78   :  { %p1578_p7 = scmp.ne.s32.totalorder %s1784_s2, %s1577_s12  ;;  %p1581_p8 = scmp.lt.u32.totalorder %s1577_s12, %s1784_s2 }
  0x7a   :  { %p1583_p9 = pnand %p1581_p8, %p1578_p7 }
  0x7c   :  { %1586 = shalt.err (!%p1583_p9)
}
  0x7d   :  { %1508 = dma.vmem_to_hbm [thread:$0]  %s1506_s8, 8320, %s1784_s2, [#allocation4]  }
  0x7e   :  { %1591 = dma.done.wait [#allocation4], 8320  }
  0x7f   :  { %1592 = vsyncadd [#allocation4], 4294958976 }
  0x80   :  { %1512 = vsyncpa [#allocation3], 1 }
  0x81   :  { %1513 = vsyncpa [#allocation6], 1 }
  0x82   :  { %1514 = vsyncpa [#allocation4], 1 }

</bundles_post_ra>
